<compile_context>
chip_gen: v6e
topology: v6e:2x2x1
jax: 0.10.0
libtpu: 0.0.40
codegen_flags: <defaults>
</compile_context>

<pallas_src>
import jax
import jax.numpy as jnp
from jax.experimental import pallas as pl
from jax.experimental.pallas import tpu as pltpu


def _round_up(n, m):
    return ((n + m - 1) // m) * m


def _choose_tile_b(B, tile_b):
    """Pick the batch tile: single 8-aligned block for small B, 128-aligned
    tiles with >=4 grid steps for large B (keeps both v7x TCs busy)."""
    if B <= 256:
        return max(8, _round_up(B, 8))
    tb = min(tile_b, _round_up(pl.cdiv(B, 4), 128))
    return max(128, _round_up(tb, 128))


def generator_kernel(x_ref, w1_ref, b1_ref, w2_ref, b2_ref, o_ref):
    # In-kernel bf16 cast of x (VPU) -> no extra HBM pass in the wrapper.
    x = x_ref[...].astype(w1_ref.dtype)
    # Layer 1: (tb, L) @ (L, H) on the MXU, f32 accumulation.
    h = jnp.dot(x, w1_ref[...], preferred_element_type=jnp.float32)
    h = jnp.maximum(h + b1_ref[...], 0.0)          # bias + ReLU in f32 (VPU)
    # Layer 2: (tb, H) @ (H, D) on the MXU, f32 accumulation.
    y = jnp.dot(h.astype(w2_ref.dtype), w2_ref[...],
                preferred_element_type=jnp.float32) + b2_ref[...]
    o_ref[...] = jnp.tanh(y).astype(o_ref.dtype)   # tanh on the EUP


def prepare_generator_params(w1, b1, w2, b2, *, mxu_dtype=jnp.bfloat16):
    """One-time weight preparation (hoisted out of the per-call forward path).
    Weights go to the MXU dtype; biases stay f32 for the epilogue."""
    return (w1.astype(mxu_dtype),
            jnp.reshape(b1, (1, -1)).astype(jnp.float32),
            w2.astype(mxu_dtype),
            jnp.reshape(b2, (1, -1)).astype(jnp.float32))


def generator_forward(x, params, *, tile_b=1024, out_dtype=None):
    """tanh(relu(x @ w1 + b1) @ w2 + b2); params from prepare_generator_params."""
    w1, b1, w2, b2 = params
    B, L = x.shape
    H = w1.shape[1]
    D = w2.shape[1]
    out_dtype = x.dtype if out_dtype is None else out_dtype
    out_bytes = int(jnp.dtype(out_dtype).itemsize)

    tb = _choose_tile_b(B, tile_b)
    grid = (pl.cdiv(B, tb),)

    # VMEM budget: x/out tiles double-buffered, grid-invariant weights/biases
    # single-buffered, plus the f32 hidden intermediate; 2x headroom, capped
    # at 48 MiB so it stays safe on v7x (64 MiB physical per TC).
    est_vmem = (2 * tb * L * int(jnp.dtype(x.dtype).itemsize)
                + 2 * tb * D * out_bytes
                + (w1.nbytes + b1.nbytes + w2.nbytes + b2.nbytes)
                + tb * H * 4 + tb * D * 4)
    vmem_limit = int(min(max(2 * est_vmem, 32 * 1024 * 1024), 48 * 1024 * 1024))

    cost = pl.CostEstimate(
        flops=2 * B * (L * H + H * D),
        transcendentals=B * D,
        bytes_accessed=(x.nbytes + w1.nbytes + b1.nbytes + w2.nbytes
                        + b2.nbytes + B * D * out_bytes),
    )

    return pl.pallas_call(
        generator_kernel,
        out_shape=jax.ShapeDtypeStruct((B, D), out_dtype),
        grid_spec=pltpu.PrefetchScalarGridSpec(
            num_scalar_prefetch=0,
            grid=grid,
            in_specs=[
                # x tile (f32 in HBM, cast to bf16 in-kernel). Partial last
                # block is handled by Pallas (reads padded, writes masked).
                pl.BlockSpec((tb, L), lambda i: (i, 0)),
                # Weights/biases: constant index_map -> grid-invariant blocks,
                # kept resident across grid steps (no per-step re-DMA).
                pl.BlockSpec((L, H), lambda i: (0, 0)),    # W1 (bf16)
                pl.BlockSpec((1, H), lambda i: (0, 0)),    # b1 (f32)
                pl.BlockSpec((H, D), lambda i: (0, 0)),    # W2 (bf16, D unpadded)
                pl.BlockSpec((1, D), lambda i: (0, 0)),    # b2 (f32)
            ],
            out_specs=pl.BlockSpec((tb, D), lambda i: (i, 0)),
        ),
        compiler_params=pltpu.CompilerParams(
            dimension_semantics=("parallel",),
            vmem_limit_bytes=vmem_limit,
        ),
        cost_estimate=cost,
    )(x, w1, b1, w2, b2)


def _init_linear(key, fan_in, fan_out, dtype=jnp.float32):
    # Matches torch.nn.Linear default init: U(-1/sqrt(fan_in), 1/sqrt(fan_in)).
    kw, kb = jax.random.split(key)
    bound = 1.0 / jnp.sqrt(jnp.float32(fan_in))
    w = jax.random.uniform(kw, (fan_in, fan_out), dtype, -bound, bound)
    b = jax.random.uniform(kb, (fan_out,), dtype, -bound, bound)
    return w, b


if __name__ == "__main__":
    latent_dim, hidden, data_dim = 32, 256, 64
    batch = 16

    key = jax.random.PRNGKey(0)
    kx, k1, k2 = jax.random.split(key, 3)

    x = jax.random.normal(kx, (batch, latent_dim), jnp.float32)
    w1, b1 = _init_linear(k1, latent_dim, hidden)
    w2, b2 = _init_linear(k2, hidden, data_dim)

    params = prepare_generator_params(w1, b1, w2, b2)
    out = generator_forward(x, params)
    out = jax.block_until_ready(out)
    assert out.shape == (batch, data_dim)

    # Tight check: reference with the same bf16 rounding applied to the MXU
    # inputs (f32 accumulation / epilogue everywhere else).
    xb = x.astype(jnp.bfloat16).astype(jnp.float32)
    w1b = w1.astype(jnp.bfloat16).astype(jnp.float32)
    w2b = w2.astype(jnp.bfloat16).astype(jnp.float32)
    h_ref = jnp.maximum(xb @ w1b + b1.reshape(1, -1), 0.0)
    ref_match = jnp.tanh(
        h_ref.astype(jnp.bfloat16).astype(jnp.float32) @ w2b + b2.reshape(1, -1))
    assert jnp.allclose(out, ref_match, atol=2e-3, rtol=0.0), \
        "mismatch vs bf16-matched reference"

    # Loose check vs the full-f32 reference (kernel feeds bf16 to the MXU).
    ref_f32 = jnp.tanh(
        jnp.maximum(x @ w1 + b1.reshape(1, -1), 0.0) @ w2 + b2.reshape(1, -1))
    assert jnp.allclose(out, ref_f32, atol=5e-2, rtol=0.0), \
        "mismatch vs f32 reference"

    print("KERNEL_OK")
</pallas_src>

<mosaic_0001>
module attributes {stable_mosaic.version = 11 : i64} {
  func.func @generator_kernel(%arg0: i32, %arg1: memref<16x32xf32, #tpu.memory_space<vmem>>, %arg2: memref<32x256xbf16, #tpu.memory_space<vmem>>, %arg3: memref<1x256xf32, #tpu.memory_space<vmem>>, %arg4: memref<256x64xbf16, #tpu.memory_space<vmem>>, %arg5: memref<1x64xf32, #tpu.memory_space<vmem>>, %arg6: memref<16x64xf32, #tpu.memory_space<vmem>>) attributes {dimension_semantics = [#tpu.dimension_semantics<parallel>], iteration_bounds = array<i64: 1>, scalar_prefetch = 0 : i64, scratch_operands = 0 : i64, tpu.core_type = #tpu.core_type<tc>, window_params = [{transform_indices = @transform_0, window_bounds = array<i64: 16, 32>}, {pipeline_mode = #tpu.pipeline_mode<synchronous>, transform_indices = @transform_1, window_bounds = array<i64: 32, 256>}, {pipeline_mode = #tpu.pipeline_mode<synchronous>, transform_indices = @transform_2, window_bounds = array<i64: 1, 256>}, {pipeline_mode = #tpu.pipeline_mode<synchronous>, transform_indices = @transform_3, window_bounds = array<i64: 256, 64>}, {pipeline_mode = #tpu.pipeline_mode<synchronous>, transform_indices = @transform_4, window_bounds = array<i64: 1, 64>}, {transform_indices = @transform_5, window_bounds = array<i64: 16, 64>}]} {
    %c0 = arith.constant 0 : index
    %c0_0 = arith.constant 0 : index
    %0 = vector.load %arg1[%c0, %c0_0] : memref<16x32xf32, #tpu.memory_space<vmem>>, vector<16x32xf32>
    %1 = arith.truncf %0 : vector<16x32xf32> to vector<16x32xbf16>
    %c0_1 = arith.constant 0 : index
    %c0_2 = arith.constant 0 : index
    %2 = vector.load %arg2[%c0_1, %c0_2] : memref<32x256xbf16, #tpu.memory_space<vmem>>, vector<32x256xbf16>
    %cst = arith.constant dense<0.000000e+00> : vector<16x256xf32>
    %3 = tpu.matmul %1, %2, %cst {dimension_numbers = #tpu.dot_dimension_numbers<[1], [0], [0], [1], [0, 0, 1, 1], [], []>} : vector<16x32xbf16>, vector<32x256xbf16>, vector<16x256xf32> -> vector<16x256xf32>
    %c0_3 = arith.constant 0 : index
    %c0_4 = arith.constant 0 : index
    %4 = vector.load %arg3[%c0_3, %c0_4] : memref<1x256xf32, #tpu.memory_space<vmem>>, vector<1x256xf32>
    %5 = vector.broadcast %4 : vector<1x256xf32> to vector<16x256xf32>
    %6 = arith.addf %3, %5 : vector<16x256xf32>
    %cst_5 = arith.constant 0.000000e+00 : f32
    %7 = vector.broadcast %cst_5 : f32 to vector<16x256xf32>
    %8 = arith.maximumf %6, %7 : vector<16x256xf32>
    %9 = arith.truncf %8 : vector<16x256xf32> to vector<16x256xbf16>
    %c0_6 = arith.constant 0 : index
    %c0_7 = arith.constant 0 : index
    %10 = vector.load %arg4[%c0_6, %c0_7] : memref<256x64xbf16, #tpu.memory_space<vmem>>, vector<256x64xbf16>
    %cst_8 = arith.constant dense<0.000000e+00> : vector<16x64xf32>
    %11 = tpu.matmul %9, %10, %cst_8 {dimension_numbers = #tpu.dot_dimension_numbers<[1], [0], [0], [1], [0, 0, 1, 1], [], []>} : vector<16x256xbf16>, vector<256x64xbf16>, vector<16x64xf32> -> vector<16x64xf32>
    %c0_9 = arith.constant 0 : index
    %c0_10 = arith.constant 0 : index
    %12 = vector.load %arg5[%c0_9, %c0_10] : memref<1x64xf32, #tpu.memory_space<vmem>>, vector<1x64xf32>
    %13 = vector.broadcast %12 : vector<1x64xf32> to vector<16x64xf32>
    %14 = arith.addf %11, %13 : vector<16x64xf32>
    %15 = math.tanh %14 : vector<16x64xf32>
    %c0_11 = arith.constant 0 : index
    %c0_12 = arith.constant 0 : index
    %16 = vector.load %arg6[%c0_11, %c0_12] : memref<16x64xf32, #tpu.memory_space<vmem>>, vector<16x64xf32>
    tpu.vector_store %arg6[%c0_11, %c0_12], %15 {strides = array<i32>} : memref<16x64xf32, #tpu.memory_space<vmem>>, vector<16x64xf32>,
    return
  }
  func.func @transform_0(%arg0: i32) -> (i32, i32) {
    %c0_i32 = arith.constant 0 : i32
    %c0_i32_0 = arith.constant 0 : i32
    return %arg0, %c0_i32 : i32, i32
  }
  func.func @transform_1(%arg0: i32) -> (i32, i32) {
    %c0_i32 = arith.constant 0 : i32
    %c0_i32_0 = arith.constant 0 : i32
    %c0_i32_1 = arith.constant 0 : i32
    return %c0_i32, %c0_i32_0 : i32, i32
  }
  func.func @transform_2(%arg0: i32) -> (i32, i32) {
    %c0_i32 = arith.constant 0 : i32
    %c0_i32_0 = arith.constant 0 : i32
    %c0_i32_1 = arith.constant 0 : i32
    return %c0_i32, %c0_i32_0 : i32, i32
  }
  func.func @transform_3(%arg0: i32) -> (i32, i32) {
    %c0_i32 = arith.constant 0 : i32
    %c0_i32_0 = arith.constant 0 : i32
    %c0_i32_1 = arith.constant 0 : i32
    return %c0_i32, %c0_i32_0 : i32, i32
  }
  func.func @transform_4(%arg0: i32) -> (i32, i32) {
    %c0_i32 = arith.constant 0 : i32
    %c0_i32_0 = arith.constant 0 : i32
    %c0_i32_1 = arith.constant 0 : i32
    return %c0_i32, %c0_i32_0 : i32, i32
  }
  func.func @transform_5(%arg0: i32) -> (i32, i32) {
    %c0_i32 = arith.constant 0 : i32
    %c0_i32_0 = arith.constant 0 : i32
    return %arg0, %c0_i32 : i32, i32
  }
}

</mosaic_0001>

<bundles_post_ra>
// kernel: tpu_custom_call.1
= control target key start
LH: loop header
LB: loop body
LE: loop exit
PB: predicated region body
PF: predicated region fallthrough
CT: control target
= control target key end

     0   :  { %v407_v2 = vmov 0   ;;  %vm61_vm0 = vcmask 261120   ;;  %s516_s0 = inlined_call_operand.vmem [shape: f32[16,32], index: 0, kind: input, shape index: {}]   ;;  %s517_s1 = inlined_call_operand.vmem [shape: bf16[32,256], index: 1, kind: input, shape index: {}]   ;;  %s518_s2 = inlined_call_operand.vmem [shape: f32[1,256], index: 2, kind: input, shape index: {}]   ;;  %s519_s3 = inlined_call_operand.vmem [shape: bf16[256,64], index: 3, kind: input, shape index: {}]   ;;  %s520_s4 = inlined_call_operand.vmem [shape: f32[1,64], index: 4, kind: input, shape index: {}]   ;;  %s521_s5 = inlined_call_operand.hbm [shape: f32[16,64], index: 5, kind: output, shape index: {}]  }
   0x1   :  { %v359_v0 = vld [vmem:[%s517_s1 + $0x14] ss:$8 sps:$4 sm:$0xff]   ;;  %v361_v1 = vld [vmem:[%s517_s1 + $0x10] ss:$8 sps:$4 sm:$0xff]   ;;  %97 = vmatprep.mubr.bf16.mxu0 %v407_v2  ;;  %v362_v3 = vld [vmem:[%s517_s1 + $0x4] ss:$8 sps:$4 sm:$0xff]  }
   0x2   :  { %77 = vmatprep.subr.bf16.mxu0 %v359_v0  ;;  %v364_v4 = vld [vmem:[%s517_s1] ss:$8 sps:$4 sm:$0xff]   ;;  %v365_v7 = vld [vmem:[%s519_s3 + $0x78] sm:$0xff]   ;;  %v367_v10 = vld [vmem:[%s519_s3 + $0x70] sm:$0xff]  }
   0x3   :  { %v22_v5 = vld [vmem:[%s516_s0] sm:$0xff]  ;;  %78 = vmatpush1.bf16.msra.mxu0 %v361_v1  ;;  %v23_v6 = vld [vmem:[%s516_s0 + $0x8] sm:$0xff]  ;;  %v366_v8 = vld [vmem:[%s519_s3 + $0x38] sm:$0xff]   ;;  %333 = vmatprep.subr.bf16.mxu1 %v365_v7 }
   0x4   :  { %79 = vmatprep.subr.bf16.mxu0 %v362_v3  ;;  %v24_v9 = vpack.c.bf16 %v23_v6, %v22_v5  ;;  %334 = vmatpush3.bf16.msra.mxu1 %v366_v8  ;;  %v368_v11 = vld [vmem:[%s519_s3 + $0x30] sm:$0xff]   ;;  %v369_v12 = vld [vmem:[%s519_s3 + $0x68] sm:$0xff]   ;;  %v371_v14 = vld [vmem:[%s519_s3 + $0x60] sm:$0xff]  }
   0x5   :  { %335 = vmatprep.subr.bf16.mxu1 %v367_v10  ;;  %v370_v13 = vld [vmem:[%s519_s3 + $0x28] sm:$0xff]   ;;  %v372_v15 = vld [vmem:[%s519_s3 + $0x20] sm:$0xff]   ;;  %v373_v16 = vld [vmem:[%s519_s3 + $0x58] sm:$0xff]  }
   0x7   :  { %80 = vmatpush1.bf16.msra.mxu0 %v364_v4 }
   0x8   :  { %336 = vmatpush3.bf16.msra.mxu1 %v368_v11 }
   0x9   :  { %337 = vmatprep.subr.bf16.mxu1 %v369_v12 }
   0xa   :  { %315 = vmatmul.mubr.msk.bf16.vlgmr.msra.gmra.mxu0 %vm61_vm0, %v24_v9 }
   0xc   :  { %338 = vmatpush3.bf16.msra.mxu1 %v370_v13 }
   0xd   :  { %339 = vmatprep.subr.bf16.mxu1 %v371_v14 }
   0xe   :  { %10 = vsyncpa [#allocation3], 0  ;;  %v374_v17 = vld [vmem:[%s519_s3 + $0x18] sm:$0xff]   ;;  %v375_v18 = vld [vmem:[%s519_s3 + $0x50] sm:$0xff]   ;;  %v31_v24 = vlaneseq  ;;  %vm292_vm1 = vcmask 523264   ;;  %s408_s0 = smov [#allocation2]  }
   0xf   :  { %v376_v19 = vld [vmem:[%s519_s3 + $0x10] sm:$0xff]   ;;  %v377_v20 = vld [vmem:[%s519_s3 + $0x48] sm:$0xff]   ;;  %v379_v22 = vld [vmem:[%s519_s3 + $0x40] sm:$0xff]   ;;  %s300_s11 = sshll.u32 %s408_s0, 4  ;;  %s301_s11 = int_to_ptr.vmem [resolvable:$true] %s300_s11 }
  0x10   :  { %340 = vmatpush3.bf16.msra.mxu1 %v372_v15  ;;  %v378_v21 = vld [vmem:[%s519_s3 + $0x8] sm:$0xff]   ;;  %v380_v23 = vld [vmem:[%s519_s3] sm:$0xff]   ;;  %v32_v25 = vshrl.u32 %v31_v24, 7  ;;  %s385_s12 = scalar_lea.vmem %s301_s11, 256  ;;  %p390_p1 = scmp.lt.s32.totalorder %s301_s11, %s301_s11 }
  0x11   :  { %341 = vmatprep.subr.bf16.mxu1 %v373_v16  ;;  %v29_v28 = vld [vmem:[%s518_s2] sm:$0x3]  ;;  %p386_p0 = scmp.ne.s32.totalorder %s301_s11, %s385_s12  ;;  %p391_p2 = scmp.lt.s32.totalorder %s385_s12, %s385_s12 }
  0x12   :  { %v37_v26 = vsub.s32 1, %v32_v25  ;;  %v33_v27 = vsub.s32 0, %v32_v25  ;;  %v316_v46 = vld [vmem:[%s520_s4] ss:$0 sm:$0xff] }
  0x13   :  { %p392_p3 = por %p391_p2, %p390_p1 }
  0x14   :  { %342 = vmatpush3.bf16.msra.mxu1 %v374_v17  ;;  %v38_v30 = vrot.slane %v29_v28, %v37_v26  ;;  %v34_v31 = vrot.slane %v29_v28, %v33_v27 }
  0x15   :  { %343 = vmatprep.subr.bf16.mxu1 %v375_v18  ;;  %p393_p4 = pnand %p392_p3, %p386_p0 }
  0x18   :  { %344 = vmatpush3.bf16.msra.mxu1 %v376_v19 }
  0x19   :  { %345 = vmatprep.subr.bf16.mxu1 %v377_v20 }
  0x1c   :  { %346 = vmatpush3.bf16.msra.mxu1 %v378_v21 }
  0x1d   :  { %347 = vmatprep.subr.bf16.mxu1 %v379_v22 }
  0x20   :  { %348 = vmatpush3.bf16.msra.mxu1 %v380_v23 }
  0xca   :  { %v99_v29 = vpop.f32.mrf.mxu0 }
  0xcb   :  { %v100_v36 = vadd.f32 %v99_v29, %v34_v31 }
  0xcc   :  { %v101_v32 = vpop.f32.mrf.mxu0 }
  0xcd   :  { %v102_v34 = vadd.f32 %v101_v32, %v38_v30  ;;  %v108_v42 = vmax.f32 %v100_v36, 0.0 }
  0xce   :  { %v103_v33 = vpop.f32.mrf.mxu0 }
  0xcf   :  { %v104_v35 = vadd.f32 %v103_v33, %v34_v31  ;;  %v109_v40 = vmax.f32 %v102_v34, 0.0 }
  0xd0   :  { %v105_v37 = vpop.f32.mrf.mxu0 }
  0xd1   :  { %v106_v38 = vadd.f32 %v105_v37, %v38_v30  ;;  %v110_v39 = vmax.f32 %v104_v35, 0.0 }
  0xd3   :  { %v111_v41 = vmax.f32 %v106_v38, 0.0  ;;  %v112_v44 = vpack.c.bf16 %v110_v39, %v108_v42 }
  0xd5   :  { %v113_v43 = vpack.c.bf16 %v111_v41, %v109_v40 }
  0xd7   :  { %281 = vmatprep.mubr.bf16.mxu1 %v113_v43 }
  0xd8   :  { %282 = vmatmul.mubr.bf16.vlgmr.msra.gmra.mxu1 %v112_v44 }
 0x198   :  { %v349_v45 = vpop.f32.mrf.mxu1 }
 0x19a   :  { %v350_v47 = vpop.f32.mrf.mxu1 }
 0x19b   :  { %v351_v48 = vadd.f32 %v350_v47, %v349_v45 }
 0x19c   :  { %v352_v49 = vpop.f32.mrf.mxu1 }
 0x19d   :  { %v284_v50 = vadd.f32 %v351_v48, %v316_v46 }
 0x19e   :  { %v353_v51 = vpop.f32.mrf.mxu1 }
 0x19f   :  { %381 = vtanh.f32 %v284_v50  ;;  %v354_v52 = vadd.f32 %v353_v51, %v352_v49 }
 0x1a1   :  { %v287_v53 = vadd.f32 %v354_v52, %v316_v46 }
 0x1a3   :  { %383 = vtanh.f32 %v287_v53 }
 0x1ac   :  { %v382_v54 = vpop.eup %381 }
 0x1ad   :  { %293 = vst.msk [vmem:[#allocation2] sm:$0xff] %vm292_vm1, %v382_v54 }
 0x1b0   :  { %v384_v55 = vpop.eup %383 }
 0x1b1   :  { %294 = vst.msk [vmem:[#allocation2 + $0x8] sm:$0xff] %vm292_vm1, %v384_v55 }
 0x1b2   :  { %396 = shalt.err (!%p393_p4)
}
 0x1b3   :  { %s409_s4 = smov 128   ;;  %s410_s13 = smov 8  }
 0x1b4   :  { %306 = dma.vmem_to_hbm [thread:$0]  %s301_s11, 256, %s521_s5, [#allocation3], %s409_s4, %s409_s4, %s410_s13  }
 0x1b5   :  { %405 = dma.done.wait [#allocation3], 256  }
 0x1b6   :  { %406 = vsyncadd [#allocation3], 4294967040 }
 0x1b7   :  { %310 = vsyncpa [#allocation3], 1 }

</bundles_post_ra>
